<compile_context>
chip_gen: v7x
topology: tpu7x:2x2x1
jax: 0.10.0
libtpu: 0.0.40
codegen_flags: <defaults>
</compile_context>

<pallas_src>
import functools

import jax
import jax.numpy as jnp
import numpy as np
from jax import lax
from jax.experimental import pallas as pl
from jax.experimental.pallas import tpu as pltpu

LATENT = 6
HIDDEN = 32
IN_DIM = LATENT + 2            # dims[0] = 8  (latent + xy)
D1_OUT = HIDDEN                # lin0: 8  -> 32
D2_OUT = HIDDEN - IN_DIM       # lin1: 32 -> 24  (layer+1 == 2 is in latent_in)
EPS = 1e-5                     # nn.LayerNorm default eps

TC = 256                       # inner lane (batch) sub-chunk processed per loop step

# Column layout of the packed per-feature parameter array (33 rows x 13 cols, f32).
(C_B0, C_G0, C_BE0,
 C_B1, C_G1, C_BE1,
 C_B2, C_G2, C_BE2,
 C_B3, C_G3, C_BE3,
 C_B4) = range(13)
NUM_PCOLS = 13
AUG = HIDDEN + 1               # max augmented feature count (32 + mean row)


def decoder_kernel(x_ref, w0_ref, w1_ref, w2_ref, w3_ref, w4_ref, pv_ref, out_ref):
    # Weights (bf16, mean-row-augmented) and packed per-feature params (f32) are
    # tiny; load once per grid step, hoisted out of the inner chunk loop.
    w0 = w0_ref[...]           # (33, 8)  bf16
    w1 = w1_ref[...]           # (25, 32) bf16
    w2 = w2_ref[...]           # (33, 32) bf16   (fused latent_in weight)
    w3 = w3_ref[...]           # (33, 32) bf16
    w4 = w4_ref[...]           # (1, 32)  bf16
    pv = pv_ref[...]           # (33, 13) f32

    def col(c, rows):
        return pv[:rows, c:c + 1]                               # (rows, 1) f32

    b0 = col(C_B0, D1_OUT + 1); g0 = col(C_G0, D1_OUT); be0 = col(C_BE0, D1_OUT)
    b1 = col(C_B1, D2_OUT + 1); g1 = col(C_G1, D2_OUT); be1 = col(C_BE1, D2_OUT)
    b2 = col(C_B2, HIDDEN + 1); g2 = col(C_G2, HIDDEN); be2 = col(C_BE2, HIDDEN)
    b3 = col(C_B3, HIDDEN + 1); g3 = col(C_G3, HIDDEN); be3 = col(C_BE3, HIDDEN)
    b4 = col(C_B4, 1)

    def mm(w, h):
        # bf16 MXU operands, f32 accumulation; element-wise math stays f32.
        return jnp.dot(w, h.astype(jnp.bfloat16), preferred_element_type=jnp.float32)

    def ln_relu(z_aug, f, g, be):
        # Row f of z_aug is the feature-mean (produced by the MXU via the
        # augmented weight row), so only the variance reduce hits the XLU.
        d = z_aug[:f, :] - z_aug[f:f + 1, :]
        var = jnp.mean(d * d, axis=0, keepdims=True)            # (1, TC) XLU reduce
        return jnp.maximum(d * lax.rsqrt(var + EPS) * g + be, 0.0)   # rsqrt -> EUP

    n_chunks = x_ref.shape[1] // TC

    def chunk(c, carry):
        off = pl.multiple_of(c * TC, TC)
        x = x_ref[:, pl.ds(off, TC)]                            # (8, TC) f32

        h0 = ln_relu(mm(w0, x) + b0, D1_OUT, g0, be0)           # (32, TC)
        h1 = ln_relu(mm(w1, h0) + b1, D2_OUT, g1, be1)          # (24, TC)
        # latent_in skip: concat along sublanes (24 = 3x8 -> aligned vreg copies),
        # then ONE fused 32x32 matmul.
        hc = jnp.concatenate([h1, x], axis=0)                   # (32, TC) f32
        h2 = ln_relu(mm(w2, hc) + b2, HIDDEN, g2, be2)          # (32, TC)
        h3 = ln_relu(mm(w3, h2) + b3, HIDDEN, g3, be3)          # (32, TC)

        out_ref[:, pl.ds(off, TC)] = jnp.tanh(mm(w4, h3) + b4)  # (1, TC) lane-dense
        return carry

    # Short, fixed trip count: unrolled fori_loop keeps per-chunk activations
    # (~8 vregs each) from blowing up the register file at large batch tiles.
    lax.fori_loop(0, n_chunks, chunk, 0, unroll=True)


def _round_up(a, b):
    return -(-a // b) * b


def _pack_kernel_params(params):
    """PyTorch-convention params -> (bf16 mean-augmented weights, packed f32 vectors)."""
    (w0, b0, g0, be0,
     w1, b1, g1, be1,
     w2, b2, g2, be2,
     w3, b3, g3, be3,
     w4, b4) = params

    def aug(w, b):
        # Extra output row = column means of W; extra bias entry = mean(b).
        # Then row F of (W_aug @ h + b_aug) is exactly mean_f(W @ h + b).
        w_aug = jnp.concatenate([w, jnp.mean(w, axis=0, keepdims=True)], axis=0)
        b_aug = jnp.concatenate([b, jnp.mean(b, keepdims=True)], axis=0)
        return w_aug, b_aug

    w0a, b0a = aug(w0, b0)     # (33, 8),  (33,)
    w1a, b1a = aug(w1, b1)     # (25, 32), (25,)
    w2a, b2a = aug(w2, b2)     # (33, 32), (33,)
    w3a, b3a = aug(w3, b3)     # (33, 32), (33,)

    pv = jnp.zeros((AUG, NUM_PCOLS), jnp.float32)
    cols = [(b0a, D1_OUT + 1), (g0, D1_OUT), (be0, D1_OUT),
            (b1a, D2_OUT + 1), (g1, D2_OUT), (be1, D2_OUT),
            (b2a, HIDDEN + 1), (g2, HIDDEN), (be2, HIDDEN),
            (b3a, HIDDEN + 1), (g3, HIDDEN), (be3, HIDDEN),
            (b4, 1)]
    for c, (v, rows) in enumerate(cols):
        pv = pv.at[:rows, c].set(v)

    bf = lambda w: w.astype(jnp.bfloat16)
    return (bf(w0a), bf(w1a), bf(w2a), bf(w3a), bf(w4)), pv


@functools.partial(jax.jit, static_argnames=("tm",))
def decoder_forward(x, params, *, tm=1024):
    """x: (N, 8) row-major [latent(6) | xy(2)]; returns (N, 1) like the torch module.

    tm is the max batch tile on the 128-lane axis (sweep 512-2048 for large N)."""
    n, f = x.shape
    assert f == IN_DIM
    assert tm % TC == 0 and tm >= TC

    # Batch tile: large enough to amortize per-grid-step overhead, but capped so
    # the 1-D "parallel" grid keeps >= ~8 steps whenever N allows (so v7x's two
    # TensorCores both get work).  VMEM is nowhere near binding at these sizes.
    tm_eff = min(tm, max(TC, _round_up(-(-n // 8), TC)))
    n_pad = _round_up(n, tm_eff)

    (w0a, w1a, w2a, w3a, w4b), pv = _pack_kernel_params(params)

    # Feature-major [8, N] layout (batch on lanes).  The transpose/pad/convert is
    # allowed to fuse into the pallas_call input fetch (allow_input_fusion) so it
    # is not a separate full-HBM relayout pass.  Padded columns are computed
    # through tanh and discarded (finite; no NaN risk).
    xt = jnp.pad(x.T.astype(jnp.float32), ((0, 0), (0, n_pad - n)))

    weights = (w0a, w1a, w2a, w3a, w4b)
    const_specs = [pl.BlockSpec(w.shape, lambda i: (0, 0)) for w in weights]
    const_specs.append(pl.BlockSpec(pv.shape, lambda i: (0, 0)))

    out = pl.pallas_call(
        decoder_kernel,
        out_shape=jax.ShapeDtypeStruct((1, n_pad), jnp.float32),
        grid_spec=pltpu.PrefetchScalarGridSpec(
            num_scalar_prefetch=0,
            grid=(n_pad // tm_eff,),
            in_specs=[pl.BlockSpec((IN_DIM, tm_eff), lambda i: (0, i))] + const_specs,
            out_specs=pl.BlockSpec((1, tm_eff), lambda i: (0, i)),
        ),
        compiler_params=pltpu.CompilerParams(
            dimension_semantics=("parallel",),
            allow_input_fusion=[0],
        ),
    )(xt, *weights, pv)

    return out[0, :n][:, None]                                  # (N, 1)


def _linear_init(key, fan_in, fan_out):
    # PyTorch nn.Linear default: U(-1/sqrt(fan_in), 1/sqrt(fan_in)) for W and b.
    kw, kb = jax.random.split(key)
    bound = 1.0 / np.sqrt(fan_in)
    w = jax.random.uniform(kw, (fan_out, fan_in), jnp.float32, -bound, bound)  # [out, in]
    b = jax.random.uniform(kb, (fan_out,), jnp.float32, -bound, bound)
    return w, b


def init_params(key):
    k0, k1, k2, k3, k4 = jax.random.split(key, 5)
    w0, b0 = _linear_init(k0, IN_DIM, D1_OUT)            # (32, 8)
    w1, b1 = _linear_init(k1, D1_OUT, D2_OUT)            # (24, 32)
    w2, b2 = _linear_init(k2, D2_OUT + IN_DIM, HIDDEN)   # (32, 32), unsplit
    w3, b3 = _linear_init(k3, HIDDEN, HIDDEN)            # (32, 32)
    w4, b4 = _linear_init(k4, HIDDEN, 1)                 # (1, 32)

    ones = lambda d: jnp.ones((d,), jnp.float32)         # LayerNorm default affine
    zeros = lambda d: jnp.zeros((d,), jnp.float32)
    return (w0, b0, ones(D1_OUT), zeros(D1_OUT),
            w1, b1, ones(D2_OUT), zeros(D2_OUT),
            w2, b2, ones(HIDDEN), zeros(HIDDEN),
            w3, b3, ones(HIDDEN), zeros(HIDDEN),
            w4, b4)


def reference_forward(x, params):
    # Plain-JAX f32 row-major replica of the PyTorch forward (eval mode).
    (w0, b0, g0, be0,
     w1, b1, g1, be1,
     w2, b2, g2, be2,
     w3, b3, g3, be3,
     w4, b4) = params

    def ln(z, g, b):
        mu = jnp.mean(z, axis=-1, keepdims=True)
        var = jnp.mean((z - mu) ** 2, axis=-1, keepdims=True)
        return (z - mu) * lax.rsqrt(var + EPS) * g + b

    relu = lambda z: jnp.maximum(z, 0.0)
    h0 = relu(ln(x @ w0.T + b0, g0, be0))
    h1 = relu(ln(h0 @ w1.T + b1, g1, be1))
    xin = jnp.concatenate([h1, x], axis=1)                # layer 2 in latent_in
    h2 = relu(ln(xin @ w2.T + b2, g2, be2))
    h3 = relu(ln(h2 @ w3.T + b3, g3, be3))
    return jnp.tanh(h3 @ w4.T + b4)                       # final self.th


if __name__ == "__main__":
    key = jax.random.PRNGKey(0)
    k_in, k_p = jax.random.split(key)

    # Small demo batch of sample points; deliberately NOT a multiple of the tile
    # to exercise the padding path (real SDF queries use N >> tm).
    N = 2000
    x = jax.random.normal(k_in, (N, IN_DIM), jnp.float32)  # [latent(6) | xy(2)]
    params = init_params(k_p)

    out = decoder_forward(x, params, tm=1024)
    out = jax.block_until_ready(out)
    assert out.shape == (N, 1)

    # bf16 MXU operands -> tolerance loosened vs the f32 reference (LayerNorm keeps
    # the error well bounded; outputs are tanh-compressed into [-1, 1]).
    ref = reference_forward(x, params)
    np.testing.assert_allclose(np.asarray(out), np.asarray(ref), rtol=0.0, atol=5e-2)
    print("KERNEL_OK")
</pallas_src>

<mosaic_0001>
module attributes {stable_mosaic.version = 11 : i64} {
  func.func @decoder_kernel(%arg0: i32, %arg1: memref<8x256xf32, #tpu.memory_space<vmem>>, %arg2: memref<33x8xbf16, #tpu.memory_space<vmem>>, %arg3: memref<25x32xbf16, #tpu.memory_space<vmem>>, %arg4: memref<33x32xbf16, #tpu.memory_space<vmem>>, %arg5: memref<33x32xbf16, #tpu.memory_space<vmem>>, %arg6: memref<1x32xbf16, #tpu.memory_space<vmem>>, %arg7: memref<33x13xf32, #tpu.memory_space<vmem>>, %arg8: memref<1x256xf32, #tpu.memory_space<vmem>>) attributes {dimension_semantics = [#tpu.dimension_semantics<parallel>], iteration_bounds = array<i64: 8>, scalar_prefetch = 0 : i64, scratch_operands = 0 : i64, tpu.core_type = #tpu.core_type<tc>, window_params = [{transform_indices = @transform_0, window_bounds = array<i64: 8, 256>}, {pipeline_mode = #tpu.pipeline_mode<synchronous>, transform_indices = @transform_1, window_bounds = array<i64: 33, 8>}, {pipeline_mode = #tpu.pipeline_mode<synchronous>, transform_indices = @transform_2, window_bounds = array<i64: 25, 32>}, {pipeline_mode = #tpu.pipeline_mode<synchronous>, transform_indices = @transform_3, window_bounds = array<i64: 33, 32>}, {pipeline_mode = #tpu.pipeline_mode<synchronous>, transform_indices = @transform_4, window_bounds = array<i64: 33, 32>}, {pipeline_mode = #tpu.pipeline_mode<synchronous>, transform_indices = @transform_5, window_bounds = array<i64: 1, 32>}, {pipeline_mode = #tpu.pipeline_mode<synchronous>, transform_indices = @transform_6, window_bounds = array<i64: 33, 13>}, {transform_indices = @transform_7, window_bounds = array<i64: 1, 256>}]} {
    %c0 = arith.constant 0 : index
    %c0_0 = arith.constant 0 : index
    %0 = vector.load %arg2[%c0, %c0_0] : memref<33x8xbf16, #tpu.memory_space<vmem>>, vector<33x8xbf16>
    %c0_1 = arith.constant 0 : index
    %c0_2 = arith.constant 0 : index
    %1 = vector.load %arg3[%c0_1, %c0_2] : memref<25x32xbf16, #tpu.memory_space<vmem>>, vector<25x32xbf16>
    %c0_3 = arith.constant 0 : index
    %c0_4 = arith.constant 0 : index
    %2 = vector.load %arg4[%c0_3, %c0_4] : memref<33x32xbf16, #tpu.memory_space<vmem>>, vector<33x32xbf16>
    %c0_5 = arith.constant 0 : index
    %c0_6 = arith.constant 0 : index
    %3 = vector.load %arg5[%c0_5, %c0_6] : memref<33x32xbf16, #tpu.memory_space<vmem>>, vector<33x32xbf16>
    %c0_7 = arith.constant 0 : index
    %c0_8 = arith.constant 0 : index
    %4 = vector.load %arg6[%c0_7, %c0_8] : memref<1x32xbf16, #tpu.memory_space<vmem>>, vector<1x32xbf16>
    %c0_9 = arith.constant 0 : index
    %c0_10 = arith.constant 0 : index
    %5 = vector.load %arg7[%c0_9, %c0_10] : memref<33x13xf32, #tpu.memory_space<vmem>>, vector<33x13xf32>
    %6 = vector.extract_strided_slice %5 {offsets = [0, 0], sizes = [33, 1], strides = [1, 1]} : vector<33x13xf32> to vector<33x1xf32>
    %7 = vector.extract_strided_slice %5 {offsets = [0, 1], sizes = [32, 1], strides = [1, 1]} : vector<33x13xf32> to vector<32x1xf32>
    %8 = vector.extract_strided_slice %5 {offsets = [0, 2], sizes = [32, 1], strides = [1, 1]} : vector<33x13xf32> to vector<32x1xf32>
    %9 = vector.extract_strided_slice %5 {offsets = [0, 3], sizes = [25, 1], strides = [1, 1]} : vector<33x13xf32> to vector<25x1xf32>
    %10 = vector.extract_strided_slice %5 {offsets = [0, 4], sizes = [24, 1], strides = [1, 1]} : vector<33x13xf32> to vector<24x1xf32>
    %11 = vector.extract_strided_slice %5 {offsets = [0, 5], sizes = [24, 1], strides = [1, 1]} : vector<33x13xf32> to vector<24x1xf32>
    %12 = vector.extract_strided_slice %5 {offsets = [0, 6], sizes = [33, 1], strides = [1, 1]} : vector<33x13xf32> to vector<33x1xf32>
    %13 = vector.extract_strided_slice %5 {offsets = [0, 7], sizes = [32, 1], strides = [1, 1]} : vector<33x13xf32> to vector<32x1xf32>
    %14 = vector.extract_strided_slice %5 {offsets = [0, 8], sizes = [32, 1], strides = [1, 1]} : vector<33x13xf32> to vector<32x1xf32>
    %15 = vector.extract_strided_slice %5 {offsets = [0, 9], sizes = [33, 1], strides = [1, 1]} : vector<33x13xf32> to vector<33x1xf32>
    %16 = vector.extract_strided_slice %5 {offsets = [0, 10], sizes = [32, 1], strides = [1, 1]} : vector<33x13xf32> to vector<32x1xf32>
    %17 = vector.extract_strided_slice %5 {offsets = [0, 11], sizes = [32, 1], strides = [1, 1]} : vector<33x13xf32> to vector<32x1xf32>
    %18 = vector.extract_strided_slice %5 {offsets = [0, 12], sizes = [1, 1], strides = [1, 1]} : vector<33x13xf32> to vector<1x1xf32>
    %c0_i32 = arith.constant 0 : i32
    %c256_i32 = arith.constant 256 : i32
    %19 = arith.muli %c0_i32, %c256_i32 : i32
    %20 = tpu.assume_multiple %19, 256 : i32
    %c0_11 = arith.constant 0 : index
    %21 = arith.index_cast %20 : i32 to index
    %22 = vector.load %arg1[%c0_11, %21] : memref<8x256xf32, #tpu.memory_space<vmem>>, vector<8x256xf32>
    %23 = arith.truncf %22 : vector<8x256xf32> to vector<8x256xbf16>
    %cst = arith.constant dense<0.000000e+00> : vector<33x256xf32>
    %24 = tpu.matmul %0, %23, %cst {dimension_numbers = #tpu.dot_dimension_numbers<[1], [0], [0], [1], [0, 0, 1, 1], [], []>} : vector<33x8xbf16>, vector<8x256xbf16>, vector<33x256xf32> -> vector<33x256xf32>
    %25 = vector.broadcast %6 : vector<33x1xf32> to vector<33x256xf32>
    %26 = arith.addf %24, %25 : vector<33x256xf32>
    %27 = vector.extract_strided_slice %26 {offsets = [0, 0], sizes = [32, 256], strides = [1, 1]} : vector<33x256xf32> to vector<32x256xf32>
    %28 = vector.extract_strided_slice %26 {offsets = [32, 0], sizes = [1, 256], strides = [1, 1]} : vector<33x256xf32> to vector<1x256xf32>
    %29 = vector.broadcast %28 : vector<1x256xf32> to vector<32x256xf32>
    %30 = arith.subf %27, %29 : vector<32x256xf32>
    %31 = arith.mulf %30, %30 : vector<32x256xf32>
    %cst_12 = arith.constant dense<0.000000e+00> : vector<256xf32>
    %32 = vector.multi_reduction <add>, %31, %cst_12 [0] : vector<32x256xf32> to vector<256xf32>
    %33 = vector.shape_cast %32 : vector<256xf32> to vector<1x256xf32>
    %cst_13 = arith.constant 3.200000e+01 : f32
    %34 = vector.broadcast %cst_13 : f32 to vector<1x256xf32>
    %35 = arith.divf %33, %34 : vector<1x256xf32>
    %cst_14 = arith.constant 9.99999974E-6 : f32
    %36 = vector.broadcast %cst_14 : f32 to vector<1x256xf32>
    %37 = arith.addf %35, %36 : vector<1x256xf32>
    %38 = math.rsqrt %37 : vector<1x256xf32>
    %39 = vector.broadcast %38 : vector<1x256xf32> to vector<32x256xf32>
    %40 = arith.mulf %30, %39 : vector<32x256xf32>
    %41 = vector.broadcast %7 : vector<32x1xf32> to vector<32x256xf32>
    %42 = arith.mulf %40, %41 : vector<32x256xf32>
    %43 = vector.broadcast %8 : vector<32x1xf32> to vector<32x256xf32>
    %44 = arith.addf %42, %43 : vector<32x256xf32>
    %cst_15 = arith.constant 0.000000e+00 : f32
    %45 = vector.broadcast %cst_15 : f32 to vector<32x256xf32>
    %46 = arith.maximumf %44, %45 : vector<32x256xf32>
    %47 = arith.truncf %46 : vector<32x256xf32> to vector<32x256xbf16>
    %cst_16 = arith.constant dense<0.000000e+00> : vector<25x256xf32>
    %48 = tpu.matmul %1, %47, %cst_16 {dimension_numbers = #tpu.dot_dimension_numbers<[1], [0], [0], [1], [0, 0, 1, 1], [], []>} : vector<25x32xbf16>, vector<32x256xbf16>, vector<25x256xf32> -> vector<25x256xf32>
    %49 = vector.broadcast %9 : vector<25x1xf32> to vector<25x256xf32>
    %50 = arith.addf %48, %49 : vector<25x256xf32>
    %51 = vector.extract_strided_slice %50 {offsets = [0, 0], sizes = [24, 256], strides = [1, 1]} : vector<25x256xf32> to vector<24x256xf32>
    %52 = vector.extract_strided_slice %50 {offsets = [24, 0], sizes = [1, 256], strides = [1, 1]} : vector<25x256xf32> to vector<1x256xf32>
    %53 = vector.broadcast %52 : vector<1x256xf32> to vector<24x256xf32>
    %54 = arith.subf %51, %53 : vector<24x256xf32>
    %55 = arith.mulf %54, %54 : vector<24x256xf32>
    %cst_17 = arith.constant dense<0.000000e+00> : vector<256xf32>
    %56 = vector.multi_reduction <add>, %55, %cst_17 [0] : vector<24x256xf32> to vector<256xf32>
    %57 = vector.shape_cast %56 : vector<256xf32> to vector<1x256xf32>
    %cst_18 = arith.constant 2.400000e+01 : f32
    %58 = vector.broadcast %cst_18 : f32 to vector<1x256xf32>
    %59 = arith.divf %57, %58 : vector<1x256xf32>
    %cst_19 = arith.constant 9.99999974E-6 : f32
    %60 = vector.broadcast %cst_19 : f32 to vector<1x256xf32>
    %61 = arith.addf %59, %60 : vector<1x256xf32>
    %62 = math.rsqrt %61 : vector<1x256xf32>
    %63 = vector.broadcast %62 : vector<1x256xf32> to vector<24x256xf32>
    %64 = arith.mulf %54, %63 : vector<24x256xf32>
    %65 = vector.broadcast %10 : vector<24x1xf32> to vector<24x256xf32>
    %66 = arith.mulf %64, %65 : vector<24x256xf32>
    %67 = vector.broadcast %11 : vector<24x1xf32> to vector<24x256xf32>
    %68 = arith.addf %66, %67 : vector<24x256xf32>
    %cst_20 = arith.constant 0.000000e+00 : f32
    %69 = vector.broadcast %cst_20 : f32 to vector<24x256xf32>
    %70 = arith.maximumf %68, %69 : vector<24x256xf32>
    %71 = tpu.concatenate %70, %22 in 0 : vector<24x256xf32>, vector<8x256xf32> -> vector<32x256xf32>
    %72 = arith.truncf %71 : vector<32x256xf32> to vector<32x256xbf16>
    %cst_21 = arith.constant dense<0.000000e+00> : vector<33x256xf32>
    %73 = tpu.matmul %2, %72, %cst_21 {dimension_numbers = #tpu.dot_dimension_numbers<[1], [0], [0], [1], [0, 0, 1, 1], [], []>} : vector<33x32xbf16>, vector<32x256xbf16>, vector<33x256xf32> -> vector<33x256xf32>
    %74 = vector.broadcast %12 : vector<33x1xf32> to vector<33x256xf32>
    %75 = arith.addf %73, %74 : vector<33x256xf32>
    %76 = vector.extract_strided_slice %75 {offsets = [0, 0], sizes = [32, 256], strides = [1, 1]} : vector<33x256xf32> to vector<32x256xf32>
    %77 = vector.extract_strided_slice %75 {offsets = [32, 0], sizes = [1, 256], strides = [1, 1]} : vector<33x256xf32> to vector<1x256xf32>
    %78 = vector.broadcast %77 : vector<1x256xf32> to vector<32x256xf32>
    %79 = arith.subf %76, %78 : vector<32x256xf32>
    %80 = arith.mulf %79, %79 : vector<32x256xf32>
    %cst_22 = arith.constant dense<0.000000e+00> : vector<256xf32>
    %81 = vector.multi_reduction <add>, %80, %cst_22 [0] : vector<32x256xf32> to vector<256xf32>
    %82 = vector.shape_cast %81 : vector<256xf32> to vector<1x256xf32>
    %cst_23 = arith.constant 3.200000e+01 : f32
    %83 = vector.broadcast %cst_23 : f32 to vector<1x256xf32>
    %84 = arith.divf %82, %83 : vector<1x256xf32>
    %cst_24 = arith.constant 9.99999974E-6 : f32
    %85 = vector.broadcast %cst_24 : f32 to vector<1x256xf32>
    %86 = arith.addf %84, %85 : vector<1x256xf32>
    %87 = math.rsqrt %86 : vector<1x256xf32>
    %88 = vector.broadcast %87 : vector<1x256xf32> to vector<32x256xf32>
    %89 = arith.mulf %79, %88 : vector<32x256xf32>
    %90 = vector.broadcast %13 : vector<32x1xf32> to vector<32x256xf32>
    %91 = arith.mulf %89, %90 : vector<32x256xf32>
    %92 = vector.broadcast %14 : vector<32x1xf32> to vector<32x256xf32>
    %93 = arith.addf %91, %92 : vector<32x256xf32>
    %cst_25 = arith.constant 0.000000e+00 : f32
    %94 = vector.broadcast %cst_25 : f32 to vector<32x256xf32>
    %95 = arith.maximumf %93, %94 : vector<32x256xf32>
    %96 = arith.truncf %95 : vector<32x256xf32> to vector<32x256xbf16>
    %cst_26 = arith.constant dense<0.000000e+00> : vector<33x256xf32>
    %97 = tpu.matmul %3, %96, %cst_26 {dimension_numbers = #tpu.dot_dimension_numbers<[1], [0], [0], [1], [0, 0, 1, 1], [], []>} : vector<33x32xbf16>, vector<32x256xbf16>, vector<33x256xf32> -> vector<33x256xf32>
    %98 = vector.broadcast %15 : vector<33x1xf32> to vector<33x256xf32>
    %99 = arith.addf %97, %98 : vector<33x256xf32>
    %100 = vector.extract_strided_slice %99 {offsets = [0, 0], sizes = [32, 256], strides = [1, 1]} : vector<33x256xf32> to vector<32x256xf32>
    %101 = vector.extract_strided_slice %99 {offsets = [32, 0], sizes = [1, 256], strides = [1, 1]} : vector<33x256xf32> to vector<1x256xf32>
    %102 = vector.broadcast %101 : vector<1x256xf32> to vector<32x256xf32>
    %103 = arith.subf %100, %102 : vector<32x256xf32>
    %104 = arith.mulf %103, %103 : vector<32x256xf32>
    %cst_27 = arith.constant dense<0.000000e+00> : vector<256xf32>
    %105 = vector.multi_reduction <add>, %104, %cst_27 [0] : vector<32x256xf32> to vector<256xf32>
    %106 = vector.shape_cast %105 : vector<256xf32> to vector<1x256xf32>
    %cst_28 = arith.constant 3.200000e+01 : f32
    %107 = vector.broadcast %cst_28 : f32 to vector<1x256xf32>
    %108 = arith.divf %106, %107 : vector<1x256xf32>
    %cst_29 = arith.constant 9.99999974E-6 : f32
    %109 = vector.broadcast %cst_29 : f32 to vector<1x256xf32>
    %110 = arith.addf %108, %109 : vector<1x256xf32>
    %111 = math.rsqrt %110 : vector<1x256xf32>
    %112 = vector.broadcast %111 : vector<1x256xf32> to vector<32x256xf32>
    %113 = arith.mulf %103, %112 : vector<32x256xf32>
    %114 = vector.broadcast %16 : vector<32x1xf32> to vector<32x256xf32>
    %115 = arith.mulf %113, %114 : vector<32x256xf32>
    %116 = vector.broadcast %17 : vector<32x1xf32> to vector<32x256xf32>
    %117 = arith.addf %115, %116 : vector<32x256xf32>
    %cst_30 = arith.constant 0.000000e+00 : f32
    %118 = vector.broadcast %cst_30 : f32 to vector<32x256xf32>
    %119 = arith.maximumf %117, %118 : vector<32x256xf32>
    %120 = arith.truncf %119 : vector<32x256xf32> to vector<32x256xbf16>
    %cst_31 = arith.constant dense<0.000000e+00> : vector<1x256xf32>
    %121 = tpu.matmul %4, %120, %cst_31 {dimension_numbers = #tpu.dot_dimension_numbers<[1], [0], [0], [1], [0, 0, 1, 1], [], []>} : vector<1x32xbf16>, vector<32x256xbf16>, vector<1x256xf32> -> vector<1x256xf32>
    %122 = vector.broadcast %18 : vector<1x1xf32> to vector<1x256xf32>
    %123 = arith.addf %121, %122 : vector<1x256xf32>
    %124 = math.tanh %123 : vector<1x256xf32>
    %c0_32 = arith.constant 0 : index
    %125 = arith.index_cast %20 : i32 to index
    %126 = vector.load %arg8[%c0_32, %125] : memref<1x256xf32, #tpu.memory_space<vmem>>, vector<1x256xf32>
    tpu.vector_store %arg8[%c0_32, %125], %124 {strides = array<i32>} : memref<1x256xf32, #tpu.memory_space<vmem>>, vector<1x256xf32>,
    %c1_i32 = arith.constant 1 : i32
    return
  }
  func.func @transform_0(%arg0: i32) -> (i32, i32) {
    %c0_i32 = arith.constant 0 : i32
    %c0_i32_0 = arith.constant 0 : i32
    return %c0_i32, %arg0 : i32, i32
  }
  func.func @transform_1(%arg0: i32) -> (i32, i32) {
    %c0_i32 = arith.constant 0 : i32
    %c0_i32_0 = arith.constant 0 : i32
    %c0_i32_1 = arith.constant 0 : i32
    return %c0_i32, %c0_i32_0 : i32, i32
  }
  func.func @transform_2(%arg0: i32) -> (i32, i32) {
    %c0_i32 = arith.constant 0 : i32
    %c0_i32_0 = arith.constant 0 : i32
    %c0_i32_1 = arith.constant 0 : i32
    return %c0_i32, %c0_i32_0 : i32, i32
  }
  func.func @transform_3(%arg0: i32) -> (i32, i32) {
    %c0_i32 = arith.constant 0 : i32
    %c0_i32_0 = arith.constant 0 : i32
    %c0_i32_1 = arith.constant 0 : i32
    return %c0_i32, %c0_i32_0 : i32, i32
  }
  func.func @transform_4(%arg0: i32) -> (i32, i32) {
    %c0_i32 = arith.constant 0 : i32
    %c0_i32_0 = arith.constant 0 : i32
    %c0_i32_1 = arith.constant 0 : i32
    return %c0_i32, %c0_i32_0 : i32, i32
  }
  func.func @transform_5(%arg0: i32) -> (i32, i32) {
    %c0_i32 = arith.constant 0 : i32
    %c0_i32_0 = arith.constant 0 : i32
    %c0_i32_1 = arith.constant 0 : i32
    return %c0_i32, %c0_i32_0 : i32, i32
  }
  func.func @transform_6(%arg0: i32) -> (i32, i32) {
    %c0_i32 = arith.constant 0 : i32
    %c0_i32_0 = arith.constant 0 : i32
    %c0_i32_1 = arith.constant 0 : i32
    return %c0_i32, %c0_i32_0 : i32, i32
  }
  func.func @transform_7(%arg0: i32) -> (i32, i32) {
    %c0_i32 = arith.constant 0 : i32
    %c0_i32_0 = arith.constant 0 : i32
    return %c0_i32, %arg0 : i32, i32
  }
}

</mosaic_0001>

<bundles_post_ra>
// kernel: decoder_forward.1
= control target key start
LH: loop header
LB: loop body
LE: loop exit
PB: predicated region body
PF: predicated region fallthrough
CT: control target
= control target key end

     0   :  { %s1467_s24 = smov 0   ;;  %s1651_s0 = inlined_call_operand.vmem [shape: f32[8,2048], index: 0, kind: input, shape index: {}]   ;;  %s1652_s1 = inlined_call_operand.vmem [shape: bf16[33,8], index: 1, kind: input, shape index: {}]   ;;  %s1653_s2 = inlined_call_operand.vmem [shape: bf16[25,32], index: 2, kind: input, shape index: {}]   ;;  %s1654_s3 = inlined_call_operand.vmem [shape: bf16[33,32], index: 3, kind: input, shape index: {}]   ;;  %s1655_s4 = inlined_call_operand.vmem [shape: bf16[33,32], index: 4, kind: input, shape index: {}]   ;;  %s1656_s5 = inlined_call_operand.vmem [shape: bf16[1,32], index: 5, kind: input, shape index: {}]   ;;  %s1657_s6 = inlined_call_operand.vmem [shape: f32[33,13], index: 6, kind: input, shape index: {}]   ;;  %s1658_s7 = inlined_call_operand.vmem [shape: f32[1,2048], index: 7, kind: output, shape index: {}]  }
   0x1 LB: > { %s1285_s25 = sadd.s32 4294967295, %s1411_s24   ;;  %p1289_p0 = scmp.ge.s32.totalorder %s1411_s24, 1  ;;  %s1411_s24 = sphi %s1467_s24, %s17_s24  }
   0x2   : > { %p238_p1 = scmp.lt.s32.totalorder %s1411_s24, 9 }
   0x4   : > { %p239_p2 = pnand %p1289_p0, %p238_p1 }
   0x5   : > { %s1290_s26 = sshll.u32 (!%p239_p2), %s1285_s25, 1  ;;  %v1413_v0 = vmov (!%p239_p2), 0   ;;  %v1484_v1 = vld [vmem:[%s1657_s6 + $0x20] sm:$0x1] (!%p239_p2)  ;;  %v1495_v3 = vld [vmem:[%s1657_s6 + $0x8] sm:$0xff] (!%p239_p2)  ;;  %v1502_v4 = vld [vmem:[%s1657_s6 + $0x10] sm:$0xff] (!%p239_p2)  ;;  %v426_v24 = vlaneseq (!%p239_p2) }
   0x6   : > { %242 = sbr.rel (%p239_p2) target bundleno = 1400 (0x578), region = 48  ;;  %p270_p3 = scmp.lt.s32.totalorder (!%p239_p2), %s1290_s26, 15  ;;  %397 = vmatprep.mubr.bf16.mxu0 (!%p239_p2), %v1413_v0  ;;  %1341 = vset.pattern.permute.xlu0 (!%p239_p2), %v1413_v0  ;;  %v1490_v2 = vld [vmem:[%s1657_s6] sm:$0xff] (!%p239_p2)  ;;  %vm358_vm0 = vcmask (!%p239_p2), 1043456   ;;  %v1514_v7 = vld [vmem:[%s1657_s6 + $0x18] sm:$0xff] (!%p239_p2)  ;;  %vm348_vm1 = vcmask (!%p239_p2), 64512  }
   0x7   : > { %1342 = vset.pattern.permute.xlu1 (!%p239_p2), %v1413_v0  ;;  %608 = vmatprep.mubr.bf16.mxu1 (!%p239_p2), %v1413_v0  ;;  %v1374_v10 = vld [vmem:[%s1652_s1] sm:$0xff] (!%p239_p2)   ;;  %v1414_v12 = vmov (!%p239_p2), 1   ;;  %v1375_v13 = vld [vmem:[%s1652_s1 + $0x8] sm:$0xff] (!%p239_p2)   ;;  %v1415_v14 = vmov (!%p239_p2), 2   ;;  %v1416_v16 = vmov (!%p239_p2), 3   ;;  %v1417_v17 = vmov (!%p239_p2), 4  }
   0x8   : > { %332 = vperm.xlu0 (!%p239_p2), %1341, %v1484_v1   ;;  %317 = vperm.xlu1 (!%p239_p2), %1342, %v1495_v3   ;;  %v1376_v15 = vld [vmem:[%s1652_s1 + $0x10] ss:$0 sps:$4 sm:$0x11] (!%p239_p2)   ;;  %v1418_v18 = vmov (!%p239_p2), 5   ;;  %v1557_v30 = vshrl.u32 (!%p239_p2), %v426_v24, 7  ;;  %vm569_vm2 = vcmask (!%p239_p2), 261120  }
   0x9   : > { %vm1232_vm3 = vcmp.lt.s32.totalorder (!%p239_p2), %v426_v24, 256 }
   0xa   : > { %v1560_v33 = vsub.s32 (!%p239_p2), 0, %v1557_v30 }
   0xc   : > { %312 = vperm.xlu0 (!%p239_p2), %1341, %v1490_v2   ;;  %322 = vperm.xlu1 (!%p239_p2), %1342, %v1502_v4  }
   0xd   : > { %s1660_s26 = smov (!%p270_p3, %s1290_s26), 15 }
   0xe   : > { %s1291_s10 = sshll.u32 %s1660_s26, 3  ;;  %s278_s23 = scalar_lea.vmem %s1658_s7, %s1660_s26 }
   0xf   : > { %s273_s15 = scalar_lea.vmem %s1651_s0, %s1291_s10 }
  0x10   : > { %v1507_v5 = vld [vmem:[%s273_s15 + $0x8] sm:$0xff]  ;;  %v1509_v6 = vld [vmem:[%s273_s15] sm:$0xff]  ;;  %327 = vperm.xlu0 %1341, %v1514_v7   ;;  %1343 = vset.pattern.permute.xlu1 %v1414_v12 }
  0x11   : > { %v309_v8 = vpack.c.bf16 %v1507_v5, %v1507_v5  ;;  %v308_v9 = vpack.c.bf16 %v1509_v6, %v1509_v6  ;;  %484 = vperm.xlu1 %1343, %v1490_v2  }
  0x13   : > { %1296 = vmatprep.subr.msk.bf16.mxu0 %vm358_vm0, %v309_v8  ;;  %v360_v11 = vsel %vm358_vm0, %v308_v9, 0 }
  0x14   : > { %366 = vmatpush1.bf16.msra.mxu0 %v360_v11  ;;  %1344 = vset.pattern.permute.xlu0 %v1414_v12 }
  0x15   : > { %488 = vperm.xlu0 %1344, %v1495_v3   ;;  %1345 = vset.pattern.permute.xlu1 %v1415_v14 }
  0x16   : > { %508 = vperm.xlu1 %1345, %v1490_v2  }
  0x17   : > { %1297 = vmatmul.mubr.msk.bf16.vlgmr.msra.gmra.mrb[0].mxu0 %vm348_vm1, %v1374_v10 }
  0x18   : > { %407 = vmatprep.mubr.bf16.mxu0 %v1413_v0 }
  0x19   : > { %492 = vperm.xlu0 %1344, %v1502_v4  }
  0x1a   : > { %512 = vperm.xlu1 %1345, %v1495_v3  }
  0x1d   : > { %1347 = vset.pattern.permute.xlu0 %v1415_v14 }
  0x1e   : > { %516 = vperm.xlu0 %1347, %v1502_v4   ;;  %1346 = vset.pattern.permute.xlu1 %v1414_v12 }
  0x1f   : > { %1298 = vmatmul.mubr.msk.bf16.gmra.mrb[4].mxu0 %vm348_vm1, %v1375_v13  ;;  %496 = vperm.xlu1 %1346, %v1514_v7  }
  0x20   : > { %417 = vmatprep.mubr.bf16.mxu0 %v1413_v0 }
  0x22   : > { %1350 = vset.pattern.permute.xlu0 %v1416_v16 }
  0x23   : > { %1348 = vset.pattern.permute.xlu1 %v1415_v14  ;;  %544 = vperm.xlu0 %1350, %v1490_v2  }
  0x24   : > { %520 = vperm.xlu1 %1348, %v1514_v7  }
  0x27   : > { %1299 = vmatmul.mubr.msk.bf16.gmra.mrb[8].mxu0 %vm348_vm1, %v1376_v15  ;;  %1351 = vset.pattern.permute.xlu0 %v1417_v17 }
  0x28   : > { %1017 = vmatprep.mubr.bf16.mxu0 %v1413_v0  ;;  %1349 = vset.pattern.permute.xlu1 %v1416_v16 }
  0x29   : > { %556 = vperm.xlu1 %1349, %v1514_v7   ;;  %679 = vperm.xlu0 %1351, %v1490_v2  }
  0x2d   : > { %548 = vperm.xlu1 %1349, %v1495_v3   ;;  %1354 = vset.pattern.permute.xlu0 %v1418_v18 }
  0x2e   : > { %701 = vperm.xlu0 %1354, %v1495_v3  }
  0x31   : > { %552 = vperm.xlu1 %1349, %v1502_v4  }
  0x35   : > { %1352 = vset.pattern.permute.xlu1 %v1417_v17 }
  0x36   : > { %683 = vperm.xlu1 %1352, %v1495_v3  }
  0x3a   : > { %1353 = vset.pattern.permute.xlu1 %v1418_v18 }
  0x3b   : > { %697 = vperm.xlu1 %1353, %v1490_v2  }
  0x3f   : > { %1355 = vset.pattern.permute.xlu1 %v1417_v17 }
  0x40   : > { %687 = vperm.xlu1 %1355, %v1502_v4  }
  0x44   : > { %1356 = vset.pattern.permute.xlu1 %v1418_v18 }
  0x45   : > { %705 = vperm.xlu1 %1356, %v1502_v4  }
  0x87   : > { %v333_v23 = vpop.permute.xlu0 %332  ;;  %v318_v28 = vpop.permute.xlu1 %317 }
  0x8b   : > { %v313_v31 = vpop.permute.xlu0 %312  ;;  %v323_v32 = vpop.permute.xlu1 %322 }
  0x8f   : > { %v328_v34 = vpop.permute.xlu0 %327 }
  0xea   : > { %v399_v19 = vpop.f32.mrb[0].mxu0 }
  0xeb   : > { %v401_v20 = vpop.f32.mrb[1].mxu0  ;;  %v400_v38 = vadd.f32 %v399_v19, %v313_v31 }
  0xec   : > { %v403_v21 = vpop.f32.mrb[2].mxu0  ;;  %v402_v39 = vadd.f32 %v401_v20, %v313_v31 }
  0xed   : > { %v405_v22 = vpop.f32.mrb[3].mxu0  ;;  %v404_v42 = vadd.f32 %v403_v21, %v318_v28  ;;  %v485_v21 = vpop.permute.xlu1 %484 }
  0xee   : > { %v406_v47 = vadd.f32 %v405_v22, %v318_v28 }
  0xf1   : > { %v509_v31 = vpop.permute.xlu1 %508 }
  0xf2   : > { %v409_v25 = vpop.f32.mrb[4].mxu0 }
  0xf3   : > { %v411_v26 = vpop.f32.mrb[5].mxu0  ;;  %v410_v43 = vadd.f32 %v409_v25, %v323_v32 }
  0xf4   : > { %v413_v27 = vpop.f32.mrb[6].mxu0  ;;  %v412_v48 = vadd.f32 %v411_v26, %v323_v32 }
  0xf5   : > { %v415_v29 = vpop.f32.mrb[7].mxu0  ;;  %v414_v44 = vadd.f32 %v413_v27, %v328_v34 }
  0xf6   : > { %v416_v49 = vadd.f32 %v415_v29, %v328_v34 }
  0xfa   : > { %v419_v35 = vpop.f32.mrb[8].mxu0 }
  0xfb   : > { %v420_v36 = vadd.f32 %v419_v35, %v333_v23  ;;  %v421_v37 = vpop.f32.mrb[9].mxu0 }
  0xfc   : > { %v422_v40 = vadd.f32 %v421_v37, %v333_v23  ;;  %v423_v41 = vpop.f32.mrb[10].mxu0 }
  0xfd   : > { %v429_v45 = vrot.slane %v420_v36, %v1560_v33  ;;  %v424_v46 = vpop.f32.mrb[11].mxu0 }
  0xfe   : > { %v433_v50 = vrot.slane %v422_v40, %v1560_v33 }
  0xff   : > { %v436_v51 = vsub.f32 %v404_v42, %v429_v45  ;;  %v438_v52 = vsub.f32 %v410_v43, %v429_v45  ;;  %v440_v53 = vsub.f32 %v414_v44, %v429_v45  ;;  %v434_v54 = vsub.f32 %v400_v38, %v429_v45  ;;  %v513_v38 = vpop.permute.xlu1 %512 }
 0x100   : > { %v437_v55 = vsub.f32 %v406_v47, %v433_v50  ;;  %v439_v56 = vsub.f32 %v412_v48, %v433_v50  ;;  %v441_v57 = vsub.f32 %v416_v49, %v433_v50  ;;  %v435_v58 = vsub.f32 %v402_v39, %v433_v50  ;;  %v489_v39 = vpop.permute.xlu0 %488 }
 0x101   : > { %v442_v59 = vmul.f32 %v434_v54, %v434_v54  ;;  %v444_v60 = vmul.f32 %v436_v51, %v436_v51  ;;  %v446_v63 = vmul.f32 %v438_v52, %v438_v52  ;;  %v448_v11 = vmul.f32 %v440_v53, %v440_v53 }
 0x102   : > { %v443_v61 = vmul.f32 %v435_v58, %v435_v58  ;;  %v445_v62 = vmul.f32 %v437_v55, %v437_v55  ;;  %v447_v9 = vmul.f32 %v439_v56, %v439_v56  ;;  %v449_v13 = vmul.f32 %v441_v57, %v441_v57 }
 0x103   : > { %v450_v8 = vadd.f32 %v444_v60, %v442_v59  ;;  %v497_v40 = vpop.permute.xlu1 %496 }
 0x104   : > { %v459_v10 = vadd.f32 %v445_v62, %v443_v61  ;;  %v493_v41 = vpop.permute.xlu0 %492 }
 0x105   : > { %v451_v12 = vadd.f32 %v450_v8, %v446_v63 }
 0x106   : > { %v460_v14 = vadd.f32 %v459_v10, %v447_v9 }
 0x107   : > { %v452_v15 = vadd.f32 %v451_v12, %v448_v11  ;;  %v521_v60 = vpop.permute.xlu1 %520 }
 0x108   : > { %v461_v16 = vadd.f32 %v460_v14, %v449_v13  ;;  %v517_v61 = vpop.permute.xlu0 %516 }
 0x109   : > { %v453_v17 = vrot.slane %v452_v15, 4 }
 0x10a   : > { %v462_v18 = vrot.slane %v461_v16, 4 }
 0x10b   : > { %v454_v19 = vadd.f32 %v453_v17, %v452_v15 }
 0x10c   : > { %v463_v20 = vadd.f32 %v462_v18, %v461_v16 }
 0x10d   : > { %v455_v22 = vrot.slane %v454_v19, 2 }
 0x10e   : > { %v464_v23 = vrot.slane %v463_v20, 2 }
 0x10f   : > { %v456_v25 = vadd.f32 %v455_v22, %v454_v19 }
 0x110   : > { %v465_v26 = vadd.f32 %v464_v23, %v463_v20 }
 0x111   : > { %v457_v27 = vrot.slane %v456_v25, 1 }
 0x112   : > { %v466_v28 = vrot.slane %v465_v26, 1 }
 0x113   : > { %v458_v29 = vadd.f32 %v457_v27, %v456_v25  ;;  %v1377_v27 = vld [vmem:[%s1653_s2] sm:$0xff]  }
 0x114   : > { %v467_v32 = vadd.f32 %v466_v28, %v465_v26  ;;  %v1378_v28 = vld [vmem:[%s1653_s2 + $0x8] sm:$0x1f]  }
 0x115   : > { %v469_v34 = vmul.f32 0.03125, %v458_v29  ;;  %v1419_v29 = vmov 6  }
 0x116   : > { %v470_v35 = vmul.f32 0.03125, %v467_v32  ;;  %1358 = vset.pattern.permute.xlu1 %v1419_v29  ;;  %1357 = vset.pattern.permute.xlu0 %v1419_v29  ;;  %v1421_v32 = vmov 8  }
 0x117   : > { %v471_v36 = vadd.f32 1e-05, %v469_v34  ;;  %725 = vperm.xlu1 %1358, %v1490_v2   ;;  %741 = vperm.xlu0 %1357, %v1484_v1   ;;  %v557_v34 = vpop.permute.xlu1 %556 }
 0x118   : > { %v472_v37 = vadd.f32 1e-05, %v470_v35 }
 0x119   : > { %1385 = vrsqrt.f32 %v471_v36 }
 0x11a   : > { %1387 = vrsqrt.f32 %v472_v37 }
 0x11b   : > { %729 = vperm.xlu1 %1358, %v1495_v3   ;;  %733 = vperm.xlu0 %1357, %v1502_v4  }
 0x11f   : > { %737 = vperm.xlu1 %1358, %v1514_v7  }
 0x123   : > { %v1386_v42 = vpop.eup %1385 }
 0x124   : > { %v1388_v43 = vpop.eup %1387  ;;  %v475_v44 = vmul.f32 %v1386_v42, %v434_v54  ;;  %v477_v45 = vmul.f32 %v1386_v42, %v436_v51  ;;  %v481_v46 = vmul.f32 %v1386_v42, %v440_v53  ;;  %v479_v47 = vmul.f32 %v1386_v42, %v438_v52 }
 0x125   : > { %v476_v48 = vmul.f32 %v1388_v43, %v435_v58  ;;  %v478_v49 = vmul.f32 %v1388_v43, %v437_v55  ;;  %v482_v50 = vmul.f32 %v1388_v43, %v441_v57  ;;  %v480_v59 = vmul.f32 %v1388_v43, %v439_v56 }
 0x126   : > { %v499_v62 = vmul.f32 %v485_v21, %v475_v44  ;;  %v501_v63 = vmul.f32 %v489_v39, %v477_v45  ;;  %v505_v8 = vmul.f32 %v497_v40, %v481_v46  ;;  %v503_v9 = vmul.f32 %v493_v41, %v479_v47 }
 0x127   : > { %v500_v10 = vmul.f32 %v485_v21, %v476_v48  ;;  %v502_v11 = vmul.f32 %v489_v39, %v478_v49  ;;  %v506_v12 = vmul.f32 %v497_v40, %v482_v50  ;;  %v504_v13 = vmul.f32 %v493_v41, %v480_v59  ;;  %v549_v39 = vpop.permute.xlu1 %548  ;;  %v545_v41 = vpop.permute.xlu0 %544 }
 0x128   : > { %v523_v14 = vadd.f32 %v509_v31, %v499_v62  ;;  %v525_v15 = vadd.f32 %v513_v38, %v501_v63  ;;  %v529_v54 = vadd.f32 %v521_v60, %v505_v8  ;;  %v527_v51 = vadd.f32 %v517_v61, %v503_v9 }
 0x129   : > { %v524_v53 = vadd.f32 %v509_v31, %v500_v10  ;;  %v530_v52 = vadd.f32 %v521_v60, %v506_v12  ;;  %v528_v58 = vadd.f32 %v517_v61, %v504_v13  ;;  %v526_v55 = vadd.f32 %v513_v38, %v502_v11 }
 0x12a   : > { %v531_v57 = vmax.f32 %v523_v14, 0.0  ;;  %v537_v56 = vmax.f32 %v529_v54, 0.0  ;;  %v535_v16 = vmax.f32 %v527_v51, 0.0  ;;  %v533_v17 = vmax.f32 %v525_v15, 0.0 }
 0x12b   : > { %v538_v18 = vmax.f32 %v530_v52, 0.0  ;;  %v536_v19 = vmax.f32 %v528_v58, 0.0  ;;  %v532_v20 = vmax.f32 %v524_v53, 0.0  ;;  %v534_v22 = vmax.f32 %v526_v55, 0.0  ;;  %v553_v43 = vpop.permute.xlu1 %552 }
 0x12c   : > { %v539_v21 = vpack.c.bf16 %v533_v17, %v531_v57  ;;  %v541_v23 = vpack.c.bf16 %v537_v56, %v535_v16  ;;  %v1420_v31 = vmov 7  }
 0x12d   : > { %v540_v25 = vpack.c.bf16 %v534_v22, %v532_v20  ;;  %v542_v26 = vpack.c.bf16 %v538_v18, %v536_v19  ;;  %1359 = vset.pattern.permute.xlu0 %v1420_v31  ;;  %1360 = vset.pattern.permute.xlu1 %v1420_v31 }
 0x12e   : > { %884 = vperm.xlu0 %1359, %v1490_v2   ;;  %888 = vperm.xlu1 %1360, %v1495_v3  }
 0x12f   : > { %576 = vmatprep.subr.bf16.mxu1 %v540_v25 }
 0x130   : > { %577 = vmatpush1.bf16.msra.mxu1 %v539_v21 }
 0x131   : > { %578 = vmatprep.subr.bf16.mxu1 %v542_v26 }
 0x132   : > { %1362 = vset.pattern.permute.xlu0 %v1421_v32  ;;  %1361 = vset.pattern.permute.xlu1 %v1421_v32 }
 0x133   : > { %912 = vperm.xlu0 %1362, %v1495_v3   ;;  %908 = vperm.xlu1 %1361, %v1490_v2  }
 0x134   : > { %579 = vmatpush1.bf16.msra.mxu1 %v541_v23 }
 0x137   : > { %1302 = vmatmul.mubr.msk.bf16.vlgmr.msra.gmra.mrb[0].mxu1 %vm569_vm2, %v1377_v27  ;;  %916 = vperm.xlu0 %1362, %v1502_v4  }
 0x138   : > { %618 = vmatprep.mubr.bf16.mxu1 %v1413_v0  ;;  %1363 = vset.pattern.permute.xlu1 %v1420_v31 }
 0x139   : > { %892 = vperm.xlu1 %1363, %v1502_v4  }
 0x13d   : > { %896 = vperm.xlu1 %1363, %v1514_v7  }
 0x13f   : > { %1303 = vmatmul.mubr.msk.bf16.gmra.mrb[4].mxu1 %vm569_vm2, %v1378_v28  ;;  %v684_v28 = vpop.permute.xlu1 %683 }
 0x140   : > { %798 = vmatprep.mubr.bf16.mxu1 %v1413_v0 }
 0x141   : > { %1364 = vset.pattern.permute.xlu1 %v1421_v32 }
 0x142   : > { %920 = vperm.xlu1 %1364, %v1514_v7  }
 0x20a   : > { %v610_v35 = vpop.f32.mrb[0].mxu1 }
 0x20b   : > { %v612_v36 = vpop.f32.mrb[1].mxu1  ;;  %v611_v48 = vadd.f32 %v610_v35, %v545_v41 }
 0x20c   : > { %v614_v37 = vpop.f32.mrb[2].mxu1  ;;  %v613_v60 = vadd.f32 %v612_v36, %v545_v41  ;;  %v698_v36 = vpop.permute.xlu1 %697 }
 0x20d   : > { %v616_v38 = vpop.f32.mrb[3].mxu1  ;;  %v615_v49 = vadd.f32 %v614_v37, %v549_v39  ;;  %v680_v37 = vpop.permute.xlu0 %679 }
 0x20e   : > { %v617_v61 = vadd.f32 %v616_v38, %v549_v39 }
 0x210   : > { %v688_v38 = vpop.permute.xlu1 %687 }
 0x212   : > { %v620_v40 = vpop.f32.mrb[4].mxu1 }
 0x213   : > { %v622_v42 = vpop.f32.mrb[5].mxu1  ;;  %v621_v50 = vadd.f32 %v620_v40, %v553_v43 }
 0x214   : > { %v624_v44 = vpop.f32.mrb[6].mxu1  ;;  %v623_v62 = vadd.f32 %v622_v42, %v553_v43 }
 0x215   : > { %v625_v45 = vadd.f32 %v624_v44, %v557_v34  ;;  %v626_v46 = vpop.f32.mrb[7].mxu1 }
 0x216   : > { %v627_v47 = vadd.f32 %v626_v46, %v557_v34 }
 0x217   : > { %v632_v59 = vrot.slane %v625_v45, %v1560_v33 }
 0x218   : > { %v636_v63 = vrot.slane %v627_v47, %v1560_v33  ;;  %v702_v47 = vpop.permute.xlu0 %701 }
 0x219   : > { %v637_v8 = vsub.f32 %v611_v48, %v632_v59  ;;  %v641_v9 = vsub.f32 %v621_v50, %v632_v59  ;;  %v639_v10 = vsub.f32 %v615_v49, %v632_v59  ;;  %v706_v59 = vpop.permute.xlu1 %705 }
 0x21a   : > { %v638_v11 = vsub.f32 %v613_v60, %v636_v63  ;;  %v642_v12 = vsub.f32 %v623_v62, %v636_v63  ;;  %v640_v13 = vsub.f32 %v617_v61, %v636_v63 }
 0x21b   : > { %v643_v14 = vmul.f32 %v637_v8, %v637_v8  ;;  %v645_v15 = vmul.f32 %v639_v10, %v639_v10  ;;  %v647_v53 = vmul.f32 %v641_v9, %v641_v9 }
 0x21c   : > { %v644_v54 = vmul.f32 %v638_v11, %v638_v11  ;;  %v646_v51 = vmul.f32 %v640_v13, %v640_v13  ;;  %v648_v58 = vmul.f32 %v642_v12, %v642_v12 }
 0x21d   : > { %v649_v52 = vadd.f32 %v645_v15, %v643_v14 }
 0x21e   : > { %v657_v55 = vadd.f32 %v646_v51, %v644_v54 }
 0x21f   : > { %v650_v57 = vadd.f32 %v649_v52, %v647_v53 }
 0x220   : > { %v658_v56 = vadd.f32 %v657_v55, %v648_v58 }
 0x221   : > { %v651_v16 = vrot.slane %v650_v57, 4 }
 0x222   : > { %v659_v17 = vrot.slane %v658_v56, 4 }
 0x223   : > { %v652_v18 = vadd.f32 %v651_v16, %v650_v57  ;;  %v1380_v16 = vld [vmem:[%s1654_s3 + $0x8] sm:$0xff]  }
 0x224   : > { %v660_v19 = vadd.f32 %v659_v17, %v658_v56  ;;  %v1379_v56 = vld [vmem:[%s1654_s3] sm:$0xff]   ;;  %v1423_v17 = vmov 10  }
 0x225   : > { %v653_v20 = vrot.slane %v652_v18, 2 }
 0x226   : > { %v661_v22 = vrot.slane %v660_v19, 2 }
 0x227   : > { %v654_v21 = vadd.f32 %v653_v20, %v652_v18  ;;  %v1424_v18 = vmov 11  }
 0x228   : > { %v662_v23 = vadd.f32 %v661_v22, %v660_v19 }
 0x229   : > { %v655_v25 = vrot.slane %v654_v21, 1 }
 0x22a   : > { %v663_v26 = vrot.slane %v662_v23, 1 }
 0x22b   : > { %v656_v27 = vadd.f32 %v655_v25, %v654_v21  ;;  %v726_v21 = vpop.permute.xlu1 %725 }
 0x22c   : > { %v664_v29 = vadd.f32 %v663_v26, %v662_v23 }
 0x22d   : > { %v666_v31 = vmul.f32 0.041666668, %v656_v27 }
 0x22e   : > { %v667_v32 = vmul.f32 0.041666668, %v664_v29 }
 0x22f   : > { %v668_v34 = vadd.f32 1e-05, %v666_v31 }
 0x230   : > { %v669_v35 = vadd.f32 1e-05, %v667_v32 }
 0x231   : > { %1389 = vrsqrt.f32 %v668_v34 }
 0x232   : > { %1391 = vrsqrt.f32 %v669_v35 }
 0x23b   : > { %v1390_v39 = vpop.eup %1389 }
 0x23c   : > { %v1392_v40 = vpop.eup %1391  ;;  %v674_v41 = vmul.f32 %v1390_v39, %v639_v10  ;;  %v676_v42 = vmul.f32 %v1390_v39, %v641_v9  ;;  %v672_v43 = vmul.f32 %v1390_v39, %v637_v8 }
 0x23d   : > { %v675_v44 = vmul.f32 %v1392_v40, %v640_v13  ;;  %v677_v45 = vmul.f32 %v1392_v40, %v642_v12  ;;  %v673_v46 = vmul.f32 %v1392_v40, %v638_v11 }
 0x23e   : > { %v692_v48 = vmul.f32 %v684_v28, %v674_v41  ;;  %v694_v49 = vmul.f32 %v688_v38, %v676_v42  ;;  %v690_v50 = vmul.f32 %v680_v37, %v672_v43 }
 0x23f   : > { %v693_v60 = vmul.f32 %v684_v28, %v675_v44  ;;  %v695_v61 = vmul.f32 %v688_v38, %v677_v45  ;;  %v691_v62 = vmul.f32 %v680_v37, %v673_v46  ;;  %v730_v28 = vpop.permute.xlu1 %729 }
 0x240   : > { %v708_v63 = vadd.f32 %v698_v36, %v690_v50  ;;  %v710_v14 = vadd.f32 %v702_v47, %v692_v48  ;;  %v712_v10 = vadd.f32 %v706_v59, %v694_v49 }
 0x241   : > { %v709_v15 = vadd.f32 %v698_v36, %v691_v62  ;;  %v713_v54 = vadd.f32 %v706_v59, %v695_v61  ;;  %v711_v51 = vadd.f32 %v702_v47, %v693_v60 }
 0x242   : > { %v714_v53 = vmax.f32 %v708_v63, 0.0  ;;  %v716_v9 = vmax.f32 %v710_v14, 0.0  ;;  %v718_v58 = vmax.f32 %v712_v10, 0.0 }
 0x243   : > { %v715_v8 = vmax.f32 %v709_v15, 0.0  ;;  %v719_v13 = vmax.f32 %v713_v54, 0.0  ;;  %v717_v12 = vmax.f32 %v711_v51, 0.0  ;;  %v738_v31 = vpop.permute.xlu1 %737 }
 0x244   : > { %v720_v11 = vpack.c.bf16 %v716_v9, %v714_v53  ;;  %v722_v57 = vpack.c.bf16 %v1509_v6, %v718_v58  ;;  %v1422_v6 = vmov 9  }
 0x245   : > { %v721_v52 = vpack.c.bf16 %v717_v12, %v715_v8  ;;  %v723_v55 = vpack.c.bf16 %v1507_v5, %v719_v13  ;;  %v1381_v5 = vld [vmem:[%s1654_s3 + $0x10] ss:$0 sps:$4 sm:$0x11]   ;;  %1366 = vset.pattern.permute.xlu1 %v1422_v6  ;;  %1365 = vset.pattern.permute.xlu0 %v1422_v6 }
 0x246   : > { %944 = vperm.xlu1 %1366, %v1490_v2   ;;  %960 = vperm.xlu0 %1365, %v1484_v1  }
 0x247   : > { %766 = vmatprep.subr.bf16.mxu1 %v721_v52 }
 0x248   : > { %767 = vmatpush1.bf16.msra.mxu1 %v720_v11 }
 0x249   : > { %768 = vmatprep.subr.bf16.mxu1 %v723_v55 }
 0x24a   : > { %948 = vperm.xlu1 %1366, %v1495_v3   ;;  %952 = vperm.xlu0 %1365, %v1502_v4  }
 0x24c   : > { %769 = vmatpush1.bf16.msra.mxu1 %v722_v57 }
 0x24e   : > { %956 = vperm.xlu1 %1366, %v1514_v7   ;;  %1367 = vset.pattern.permute.xlu0 %v1423_v17 }
 0x24f   : > { %1307 = vmatmul.mubr.msk.bf16.vlgmr.msra.gmra.mrb[8].mxu1 %vm569_vm2, %v1379_v56  ;;  %1103 = vperm.xlu0 %1367, %v1490_v2  }
 0x250   : > { %808 = vmatprep.mubr.bf16.mxu1 %v1413_v0 }
 0x252   : > { %1368 = vset.pattern.permute.xlu1 %v1423_v17 }
 0x253   : > { %1107 = vperm.xlu1 %1368, %v1495_v3   ;;  %1370 = vset.pattern.permute.xlu0 %v1424_v18 }
 0x254   : > { %1131 = vperm.xlu0 %1370, %v1495_v3   ;;  %v742_v3 = vpop.permute.xlu0 %741 }
 0x257   : > { %1308 = vmatmul.mubr.msk.bf16.gmra.mrb[12].mxu1 %vm569_vm2, %v1380_v16  ;;  %1369 = vset.pattern.permute.xlu1 %v1424_v18 }
 0x258   : > { %818 = vmatprep.mubr.bf16.mxu1 %v1413_v0  ;;  %1127 = vperm.xlu1 %1369, %v1490_v2   ;;  %v734_v29 = vpop.permute.xlu0 %733 }
 0x259   : > { %1135 = vperm.xlu0 %1370, %v1502_v4  }
 0x25c   : > { %1371 = vset.pattern.permute.xlu1 %v1423_v17 }
 0x25d   : > { %1111 = vperm.xlu1 %1371, %v1502_v4  }
 0x25f   : > { %1309 = vmatmul.mubr.msk.bf16.gmra.mrb[16].mxu1 %vm569_vm2, %v1381_v5  ;;  %v889_v5 = vpop.permute.xlu1 %888 }
 0x260   : > { %1201 = vmatprep.mubr.bf16.mxu1 %v1413_v0 }
 0x261   : > { %1115 = vperm.xlu1 %1371, %v1514_v7  }
 0x265   : > { %1372 = vset.pattern.permute.xlu1 %v1424_v18 }
 0x266   : > { %1139 = vperm.xlu1 %1372, %v1514_v7  }
 0x322   : > { %v800_v1 = vpop.f32.mrb[8].mxu1 }
 0x323   : > { %v802_v19 = vpop.f32.mrb[9].mxu1  ;;  %v801_v35 = vadd.f32 %v800_v1, %v726_v21 }
 0x324   : > { %v804_v20 = vpop.f32.mrb[10].mxu1  ;;  %v803_v36 = vadd.f32 %v802_v19, %v726_v21  ;;  %v909_v21 = vpop.permute.xlu1 %908 }
 0x325   : > { %v806_v22 = vpop.f32.mrb[11].mxu1  ;;  %v805_v38 = vadd.f32 %v804_v20, %v730_v28 }
 0x326   : > { %v807_v43 = vadd.f32 %v806_v22, %v730_v28 }
 0x328   : > { %v893_v28 = vpop.permute.xlu1 %892 }
 0x32a   : > { %v810_v23 = vpop.f32.mrb[12].mxu1 }
 0x32b   : > { %v812_v25 = vpop.f32.mrb[13].mxu1  ;;  %v811_v39 = vadd.f32 %v810_v23, %v734_v29 }
 0x32c   : > { %v814_v26 = vpop.f32.mrb[14].mxu1  ;;  %v813_v44 = vadd.f32 %v812_v25, %v734_v29  ;;  %v885_v29 = vpop.permute.xlu0 %884 }
 0x32d   : > { %v816_v27 = vpop.f32.mrb[15].mxu1  ;;  %v815_v40 = vadd.f32 %v814_v26, %v738_v31 }
 0x32e   : > { %v817_v45 = vadd.f32 %v816_v27, %v738_v31  ;;  %v897_v31 = vpop.permute.xlu1 %896 }
 0x332   : > { %v820_v32 = vpop.f32.mrb[16].mxu1 }
 0x333   : > { %v821_v4 = vadd.f32 %v820_v32, %v742_v3  ;;  %v822_v34 = vpop.f32.mrb[17].mxu1  ;;  %v913_v32 = vpop.permute.xlu0 %912 }
 0x334   : > { %v823_v37 = vadd.f32 %v822_v34, %v742_v3  ;;  %v824_v7 = vpop.f32.mrb[18].mxu1 }
 0x335   : > { %v830_v41 = vrot.slane %v821_v4, %v1560_v33  ;;  %v825_v42 = vpop.f32.mrb[19].mxu1 }
 0x336   : > { %v834_v46 = vrot.slane %v823_v37, %v1560_v33  ;;  %v921_v42 = vpop.permute.xlu1 %920 }
 0x337   : > { %v835_v47 = vsub.f32 %v801_v35, %v830_v41  ;;  %v839_v48 = vsub.f32 %v811_v39, %v830_v41  ;;  %v841_v49 = vsub.f32 %v815_v40, %v830_v41  ;;  %v837_v50 = vsub.f32 %v805_v38, %v830_v41 }
 0x338   : > { %v836_v59 = vsub.f32 %v803_v36, %v834_v46  ;;  %v840_v60 = vsub.f32 %v813_v44, %v834_v46  ;;  %v842_v61 = vsub.f32 %v817_v45, %v834_v46  ;;  %v838_v62 = vsub.f32 %v807_v43, %v834_v46  ;;  %v917_v43 = vpop.permute.xlu0 %916 }
 0x339   : > { %v843_v63 = vmul.f32 %v835_v47, %v835_v47  ;;  %v845_v14 = vmul.f32 %v837_v50, %v837_v50  ;;  %v847_v51 = vmul.f32 %v839_v48, %v839_v48  ;;  %v849_v8 = vmul.f32 %v841_v49, %v841_v49 }
 0x33a   : > { %v844_v15 = vmul.f32 %v836_v59, %v836_v59  ;;  %v846_v54 = vmul.f32 %v838_v62, %v838_v62  ;;  %v848_v10 = vmul.f32 %v840_v60, %v840_v60  ;;  %v850_v12 = vmul.f32 %v842_v61, %v842_v61 }
 0x33b   : > { %v851_v53 = vadd.f32 %v845_v14, %v843_v63 }
 0x33c   : > { %v860_v9 = vadd.f32 %v846_v54, %v844_v15 }
 0x33d   : > { %v852_v13 = vadd.f32 %v851_v53, %v847_v51 }
 0x33e   : > { %v861_v11 = vadd.f32 %v860_v9, %v848_v10 }
 0x33f   : > { %v853_v52 = vadd.f32 %v852_v13, %v849_v8 }
 0x340   : > { %v862_v58 = vadd.f32 %v861_v11, %v850_v12 }
 0x341   : > { %v854_v55 = vrot.slane %v853_v52, 4 }
 0x342   : > { %v863_v57 = vrot.slane %v862_v58, 4 }
 0x343   : > { %v855_v56 = vadd.f32 %v854_v55, %v853_v52 }
 0x344   : > { %v864_v16 = vadd.f32 %v863_v57, %v862_v58 }
 0x345   : > { %v856_v6 = vrot.slane %v855_v56, 2 }
 0x346   : > { %v865_v17 = vrot.slane %v864_v16, 2 }
 0x347   : > { %v857_v18 = vadd.f32 %v856_v6, %v855_v56  ;;  %v1384_v6 = vld [vmem:[%s1655_s4 + $0x10] ss:$0 sps:$4 sm:$0x11]  }
 0x348   : > { %v866_v1 = vadd.f32 %v865_v17, %v864_v16  ;;  %v1382_v16 = vld [vmem:[%s1655_s4] sm:$0xff]   ;;  %v1425_v17 = vmov 12  }
 0x349   : > { %v858_v19 = vrot.slane %v857_v18, 1  ;;  %1373 = vset.pattern.permute.xlu0 %v1425_v17 }
 0x34a   : > { %v867_v20 = vrot.slane %v866_v1, 1  ;;  %1163 = vperm.xlu0 %1373, %v1490_v2  }
 0x34b   : > { %v859_v22 = vadd.f32 %v858_v19, %v857_v18 }
 0x34c   : > { %v868_v23 = vadd.f32 %v867_v20, %v866_v1 }
 0x34d   : > { %v869_v3 = vmul.f32 0.03125, %v859_v22  ;;  %v945_v22 = vpop.permute.xlu1 %944 }
 0x34e   : > { %v870_v25 = vmul.f32 0.03125, %v868_v23  ;;  %v961_v23 = vpop.permute.xlu0 %960 }
 0x34f   : > { %v871_v26 = vadd.f32 1e-05, %v869_v3 }
 0x350   : > { %v872_v27 = vadd.f32 1e-05, %v870_v25 }
 0x351   : > { %1393 = vrsqrt.f32 %v871_v26  ;;  %v949_v26 = vpop.permute.xlu1 %948 }
 0x352   : > { %1395 = vrsqrt.f32 %v872_v27  ;;  %v953_v27 = vpop.permute.xlu0 %952 }
 0x35b   : > { %v1394_v4 = vpop.eup %1393 }
 0x35c   : > { %v1396_v34 = vpop.eup %1395  ;;  %v877_v35 = vmul.f32 %v1394_v4, %v837_v50  ;;  %v879_v36 = vmul.f32 %v1394_v4, %v839_v48  ;;  %v875_v37 = vmul.f32 %v1394_v4, %v835_v47  ;;  %v881_v7 = vmul.f32 %v1394_v4, %v841_v49 }
 0x35d   : > { %v878_v38 = vmul.f32 %v1396_v34, %v838_v62  ;;  %v880_v39 = vmul.f32 %v1396_v34, %v840_v60  ;;  %v876_v40 = vmul.f32 %v1396_v34, %v836_v59  ;;  %v882_v41 = vmul.f32 %v1396_v34, %v842_v61 }
 0x35e   : > { %v901_v44 = vmul.f32 %v889_v5, %v877_v35  ;;  %v903_v45 = vmul.f32 %v893_v28, %v879_v36  ;;  %v899_v46 = vmul.f32 %v885_v29, %v875_v37  ;;  %v905_v63 = vmul.f32 %v897_v31, %v881_v7 }
 0x35f   : > { %v902_v14 = vmul.f32 %v889_v5, %v878_v38  ;;  %v904_v15 = vmul.f32 %v893_v28, %v880_v39  ;;  %v900_v54 = vmul.f32 %v885_v29, %v876_v40  ;;  %v906_v51 = vmul.f32 %v897_v31, %v882_v41  ;;  %v1383_v5 = vld [vmem:[%s1655_s4 + $0x8] sm:$0xff]   ;;  %v957_v28 = vpop.permute.xlu1 %956 }
 0x360   : > { %v923_v53 = vadd.f32 %v909_v21, %v899_v46  ;;  %v925_v10 = vadd.f32 %v913_v32, %v901_v44  ;;  %v929_v50 = vadd.f32 %v921_v42, %v905_v63  ;;  %v927_v48 = vadd.f32 %v917_v43, %v903_v45 }
 0x361   : > { %v924_v47 = vadd.f32 %v909_v21, %v900_v54  ;;  %v926_v49 = vadd.f32 %v913_v32, %v902_v14  ;;  %v930_v62 = vadd.f32 %v921_v42, %v906_v51  ;;  %v928_v60 = vadd.f32 %v917_v43, %v904_v15 }
 0x362   : > { %v931_v59 = vmax.f32 %v923_v53, 0.0  ;;  %v933_v61 = vmax.f32 %v925_v10, 0.0  ;;  %v937_v9 = vmax.f32 %v929_v50, 0.0  ;;  %v935_v8 = vmax.f32 %v927_v48, 0.0 }
 0x363   : > { %v932_v13 = vmax.f32 %v924_v47, 0.0  ;;  %v934_v12 = vmax.f32 %v926_v49, 0.0  ;;  %v938_v11 = vmax.f32 %v930_v62, 0.0  ;;  %v936_v52 = vmax.f32 %v928_v60, 0.0 }
 0x364   : > { %v939_v58 = vpack.c.bf16 %v933_v61, %v931_v59  ;;  %v941_v55 = vpack.c.bf16 %v937_v9, %v935_v8 }
 0x365   : > { %v940_v57 = vpack.c.bf16 %v934_v12, %v932_v13  ;;  %v942_v56 = vpack.c.bf16 %v938_v11, %v936_v52 }
 0x367   : > { %985 = vmatprep.subr.bf16.mxu0 %v940_v57 }
 0x368   : > { %986 = vmatpush1.bf16.msra.mxu0 %v939_v58 }
 0x369   : > { %987 = vmatprep.subr.bf16.mxu0 %v942_v56 }
 0x36c   : > { %988 = vmatpush1.bf16.msra.mxu0 %v941_v55  ;;  %v1108_v55 = vpop.permute.xlu1 %1107 }
 0x36f   : > { %1313 = vmatmul.mubr.msk.bf16.vlgmr.msra.gmra.mrb[12].mxu0 %vm569_vm2, %v1382_v16 }
 0x370   : > { %1027 = vmatprep.mubr.bf16.mxu0 %v1413_v0 }
 0x377   : > { %1314 = vmatmul.mubr.msk.bf16.gmra.mrb[16].mxu0 %vm569_vm2, %v1383_v5 }
 0x378   : > { %1037 = vmatprep.mubr.bf16.mxu0 %v1413_v0 }
 0x37f   : > { %1315 = vmatmul.mubr.msk.bf16.gmra.mrb[20].mxu0 %vm569_vm2, %v1384_v6 }
 0x442   : > { %v1019_v18 = vpop.f32.mrb[12].mxu0 }
 0x443   : > { %v1021_v1 = vpop.f32.mrb[13].mxu0  ;;  %v1020_v4 = vadd.f32 %v1019_v18, %v945_v22 }
 0x444   : > { %v1023_v19 = vpop.f32.mrb[14].mxu0  ;;  %v1022_v34 = vadd.f32 %v1021_v1, %v945_v22  ;;  %v1128_v1 = vpop.permute.xlu1 %1127 }
 0x445   : > { %v1025_v20 = vpop.f32.mrb[15].mxu0  ;;  %v1024_v36 = vadd.f32 %v1023_v19, %v949_v26 }
 0x446   : > { %v1026_v40 = vadd.f32 %v1025_v20, %v949_v26 }
 0x44a   : > { %v1029_v21 = vpop.f32.mrb[16].mxu0 }
 0x44b   : > { %v1031_v3 = vpop.f32.mrb[17].mxu0  ;;  %v1030_v37 = vadd.f32 %v1029_v21, %v953_v27 }
 0x44c   : > { %v1033_v25 = vpop.f32.mrb[18].mxu0  ;;  %v1032_v41 = vadd.f32 %v1031_v3, %v953_v27  ;;  %v1112_v3 = vpop.permute.xlu1 %1111 }
 0x44d   : > { %v1035_v0 = vpop.f32.mrb[19].mxu0  ;;  %v1034_v7 = vadd.f32 %v1033_v25, %v957_v28  ;;  %v1104_v25 = vpop.permute.xlu0 %1103 }
 0x44e   : > { %v1036_v42 = vadd.f32 %v1035_v0, %v957_v28 }
 0x450   : > { %v1116_v0 = vpop.permute.xlu1 %1115 }
 0x451   : > { %v1132_v26 = vpop.permute.xlu0 %1131 }
 0x452   : > { %v1039_v29 = vpop.f32.mrb[20].mxu0 }
 0x453   : > { %v1040_v31 = vadd.f32 %v1039_v29, %v961_v23  ;;  %v1041_v32 = vpop.f32.mrb[21].mxu0 }
 0x454   : > { %v1042_v35 = vadd.f32 %v1041_v32, %v961_v23  ;;  %v1043_v2 = vpop.f32.mrb[22].mxu0 }
 0x455   : > { %v1049_v38 = vrot.slane %v1040_v31, %v1560_v33  ;;  %v1044_v39 = vpop.f32.mrb[23].mxu0 }
 0x456   : > { %v1053_v43 = vrot.slane %v1042_v35, %v1560_v33 }
 0x457   : > { %v1054_v44 = vsub.f32 %v1020_v4, %v1049_v38  ;;  %v1058_v45 = vsub.f32 %v1030_v37, %v1049_v38  ;;  %v1060_v46 = vsub.f32 %v1034_v7, %v1049_v38  ;;  %v1056_v63 = vsub.f32 %v1024_v36, %v1049_v38  ;;  %v1140_v37 = vpop.permute.xlu1 %1139  ;;  %v1136_v7 = vpop.permute.xlu0 %1135 }
 0x458   : > { %v1055_v14 = vsub.f32 %v1022_v34, %v1053_v43  ;;  %v1059_v15 = vsub.f32 %v1032_v41, %v1053_v43  ;;  %v1061_v54 = vsub.f32 %v1036_v42, %v1053_v43  ;;  %v1057_v51 = vsub.f32 %v1026_v40, %v1053_v43 }
 0x459   : > { %v1062_v53 = vmul.f32 %v1054_v44, %v1054_v44  ;;  %v1064_v10 = vmul.f32 %v1056_v63, %v1056_v63  ;;  %v1066_v47 = vmul.f32 %v1058_v45, %v1058_v45  ;;  %v1068_v59 = vmul.f32 %v1060_v46, %v1060_v46 }
 0x45a   : > { %v1063_v50 = vmul.f32 %v1055_v14, %v1055_v14  ;;  %v1065_v48 = vmul.f32 %v1057_v51, %v1057_v51  ;;  %v1067_v62 = vmul.f32 %v1059_v15, %v1059_v15  ;;  %v1069_v9 = vmul.f32 %v1061_v54, %v1061_v54 }
 0x45b   : > { %v1070_v49 = vadd.f32 %v1064_v10, %v1062_v53 }
 0x45c   : > { %v1079_v60 = vadd.f32 %v1065_v48, %v1063_v50 }
 0x45d   : > { %v1071_v61 = vadd.f32 %v1070_v49, %v1066_v47 }
 0x45e   : > { %v1080_v33 = vadd.f32 %v1079_v60, %v1067_v62 }
 0x45f   : > { %v1072_v8 = vadd.f32 %v1071_v61, %v1068_v59 }
 0x460   : > { %v1081_v13 = vadd.f32 %v1080_v33, %v1069_v9 }
 0x461   : > { %v1073_v12 = vrot.slane %v1072_v8, 4 }
 0x462   : > { %v1082_v11 = vrot.slane %v1081_v13, 4 }
 0x463   : > { %v1074_v52 = vadd.f32 %v1073_v12, %v1072_v8  ;;  %v300_v12 = vld [vmem:[%s1656_s5] sm:$0x1] }
 0x464   : > { %v1083_v58 = vadd.f32 %v1082_v11, %v1081_v13  ;;  %v1164_v11 = vpop.permute.xlu0 %1163 }
 0x465   : > { %v1075_v57 = vrot.slane %v1074_v52, 2 }
 0x466   : > { %v1084_v56 = vrot.slane %v1083_v58, 2 }
 0x467   : > { %v1076_v16 = vadd.f32 %v1075_v57, %v1074_v52 }
 0x468   : > { %v1085_v5 = vadd.f32 %v1084_v56, %v1083_v58 }
 0x469   : > { %v1077_v6 = vrot.slane %v1076_v16, 1 }
 0x46a   : > { %v1086_v17 = vrot.slane %v1085_v5, 1 }
 0x46b   : > { %v1078_v18 = vadd.f32 %v1077_v6, %v1076_v16 }
 0x46c   : > { %v1087_v19 = vadd.f32 %v1086_v17, %v1085_v5  ;;  %v1426_v5 = vmov 1966171168  }
 0x46d   : > { %v1088_v20 = vmul.f32 0.03125, %v1078_v18  ;;  %v1216_v6 = vunpack.c.l.s4 %v1426_v5 }
 0x46e   : > { %v1089_v22 = vmul.f32 0.03125, %v1087_v19 }
 0x46f   : > { %v1090_v21 = vadd.f32 1e-05, %v1088_v20  ;;  %v1217_v17 = vunpack.c.0.s8 %v1216_v6 }
 0x470   : > { %v1091_v23 = vadd.f32 1e-05, %v1089_v22 }
 0x471   : > { %1397 = vrsqrt.f32 %v1090_v21 }
 0x472   : > { %1399 = vrsqrt.f32 %v1091_v23 }
 0x47b   : > { %v1398_v27 = vpop.eup %1397 }
 0x47c   : > { %v1400_v28 = vpop.eup %1399  ;;  %v1096_v29 = vmul.f32 %v1398_v27, %v1056_v63  ;;  %v1098_v31 = vmul.f32 %v1398_v27, %v1058_v45  ;;  %v1094_v32 = vmul.f32 %v1398_v27, %v1054_v44  ;;  %v1100_v4 = vmul.f32 %v1398_v27, %v1060_v46 }
 0x47d   : > { %v1097_v34 = vmul.f32 %v1400_v28, %v1057_v51  ;;  %v1099_v35 = vmul.f32 %v1400_v28, %v1059_v15  ;;  %v1095_v2 = vmul.f32 %v1400_v28, %v1055_v14  ;;  %v1101_v36 = vmul.f32 %v1400_v28, %v1061_v54 }
 0x47e   : > { %v1120_v38 = vmul.f32 %v1108_v55, %v1096_v29  ;;  %v1122_v39 = vmul.f32 %v1112_v3, %v1098_v31  ;;  %v1118_v40 = vmul.f32 %v1104_v25, %v1094_v32  ;;  %v1124_v41 = vmul.f32 %v1116_v0, %v1100_v4 }
 0x47f   : > { %v1121_v42 = vmul.f32 %v1108_v55, %v1097_v34  ;;  %v1123_v43 = vmul.f32 %v1112_v3, %v1099_v35  ;;  %v1119_v53 = vmul.f32 %v1104_v25, %v1095_v2  ;;  %v1125_v10 = vmul.f32 %v1116_v0, %v1101_v36 }
 0x480   : > { %v1142_v50 = vadd.f32 %v1128_v1, %v1118_v40  ;;  %v1144_v48 = vadd.f32 %v1132_v26, %v1120_v38  ;;  %v1148_v63 = vadd.f32 %v1140_v37, %v1124_v41  ;;  %v1146_v45 = vadd.f32 %v1136_v7, %v1122_v39 }
 0x481   : > { %v1143_v44 = vadd.f32 %v1128_v1, %v1119_v53  ;;  %v1145_v46 = vadd.f32 %v1132_v26, %v1121_v42  ;;  %v1149_v51 = vadd.f32 %v1140_v37, %v1125_v10  ;;  %v1147_v15 = vadd.f32 %v1136_v7, %v1123_v43 }
 0x482   : > { %v1150_v14 = vmax.f32 %v1142_v50, 0.0  ;;  %v1152_v54 = vmax.f32 %v1144_v48, 0.0  ;;  %v1156_v47 = vmax.f32 %v1148_v63, 0.0  ;;  %v1154_v49 = vmax.f32 %v1146_v45, 0.0 }
 0x483   : > { %v1151_v62 = vmax.f32 %v1143_v44, 0.0  ;;  %v1153_v60 = vmax.f32 %v1145_v46, 0.0  ;;  %v1157_v59 = vmax.f32 %v1149_v51, 0.0  ;;  %v1155_v61 = vmax.f32 %v1147_v15, 0.0 }
 0x484   : > { %v1158_v9 = vpack.c.bf16 %v1152_v54, %v1150_v14  ;;  %v1160_v33 = vpack.c.bf16 %v1156_v47, %v1154_v49  ;;  %v1220_v1 = vsub.s32 %v1217_v17, %v1557_v30 }
 0x485   : > { %v1159_v8 = vpack.c.bf16 %v1153_v60, %v1151_v62  ;;  %v1161_v13 = vpack.c.bf16 %v1157_v59, %v1155_v61 }
 0x487   : > { %1169 = vmatprep.subr.bf16.mxu1 %v1159_v8 }
 0x488   : > { %1170 = vmatpush1.bf16.msra.mxu1 %v1158_v9 }
 0x489   : > { %1171 = vmatprep.subr.bf16.mxu1 %v1161_v13 }
 0x48c   : > { %1172 = vmatpush1.bf16.msra.mxu1 %v1160_v33 }
 0x48f   : > { %1316 = vmatmul.mubr.msk.bf16.vlgmr.msra.gmra.mrb[20].mxu1 %vm569_vm2, %v300_v12 }
 0x562   : > { %v1203_v52 = vpop.f32.mrb[20].mxu1 }
 0x563   : > { %v1205_v58 = vpop.f32.mrb[21].mxu1  ;;  %v1204_v55 = vadd.f32 %v1203_v52, %v1164_v11 }
 0x564   : > { %v1207_v57 = vpop.f32.mrb[22].mxu1  ;;  %v1206_v56 = vadd.f32 %v1205_v58, %v1164_v11 }
 0x565   : > { %1401 = vtanh.f32 %v1204_v55  ;;  %v1208_v16 = vpop.f32.mrb[23].mxu1 }
 0x566   : > { %1403 = vtanh.f32 %v1206_v56 }
 0x56f   : > { %v1402_v18 = vpop.eup %1401 }
 0x570   : > { %v1404_v19 = vpop.eup %1403 }
 0x571   : > { %v1214_v20 = vcombine.low %v1402_v18, %v1404_v19 }
 0x573   : > { %v1221_v22 = vrot.slane %v1214_v20, %v1220_v1 }
 0x575   : > { %v1228_v21 = vrot.slane %v1221_v22, %v1220_v1 }
 0x577   : > { %1234 = vst.msk [vmem:[%s278_s23] sm:$0x3] %vm1232_vm3, %v1228_v21 }
 0x578 PF: > { %s17_s24 = sadd.s32 1, %s1411_s24  }
 0x579   : > { %p14_p4 = scmp.ge.s32.totalorder %s17_s24, 10  }
 0x57b   :  { %16 = sbr.rel (!%p14_p4) target bundleno = 1 (0x1), region = 78 }

</bundles_post_ra>
